<compile_context>
chip_gen: v7x
topology: tpu7x:2x2x1
jax: 0.10.0
libtpu: 0.0.40
codegen_flags: <defaults>
</compile_context>

<pallas_src>
import math

import jax
import jax.numpy as jnp
from jax import lax
from jax.experimental import pallas as pl
from jax.experimental.pallas import tpu as pltpu

H1, H2 = 200, 50            # logical hidden sizes (match the PyTorch module)
H1_PAD, H2_PAD = 256, 128   # lane-aligned padded sizes


def _round_up(n, m):
    return ((n + m - 1) // m) * m


def _critic_kernel(xu_ref, w1_ref, b1_ref, w2x_ref, w2u_ref, b2_ref,
                   w3_ref, b3_ref, o_ref):
    xu = xu_ref[...]                                                   # bf16 [bm, in_dim]

    # Layer 1: relu(x @ W1 + b1)  ==  relu(xu @ W1_ext + b1)           -> f32 [bm, 256]
    h1 = jnp.dot(xu, w1_ref[...], preferred_element_type=jnp.float32)
    h1 = jnp.maximum(h1 + b1_ref[...], 0.0)

    # Layer 2: relu(cat([h1, u], 1) @ W2 + b2)
    #          == relu(h1 @ W2x + xu @ W2u_ext + b2)                   -> f32 [bm, 128]
    h2 = (jnp.dot(h1.astype(jnp.bfloat16), w2x_ref[...],
                  preferred_element_type=jnp.float32)
          + jnp.dot(xu, w2u_ref[...], preferred_element_type=jnp.float32))
    h2 = jnp.maximum(h2 + b2_ref[...], 0.0)

    # Layer 3: w3_row [1,128] contracted against h2's lane dim -> lane-dense [1, bm].
    o = lax.dot_general(w3_ref[...], h2,
                        dimension_numbers=(((1,), (1,)), ((), ())),
                        preferred_element_type=jnp.float32)
    o = o + b3_ref[0, 0]
    o_ref[...] = o.reshape(1, 1, -1).astype(o_ref.dtype)


def ddpg_critic(x, u, padded_params, *, block_m=1024):
    """Pallas forward of DDPG_Critic: x [B, state_dim], u [B, action_dim] -> [B, 1]."""
    B, state_dim = x.shape
    action_dim = u.shape[1]
    in_dim = state_dim + action_dim
    w1e, b1, w2x, w2ue, b2, w3row, b3 = padded_params

    # Guard against callers skipping pad_params.
    assert w1e.shape == (in_dim, H1_PAD), w1e.shape
    assert w2x.shape == (H1_PAD, H2_PAD) and w2ue.shape == (in_dim, H2_PAD)
    assert b1.shape == (1, H1_PAD) and b2.shape == (1, H2_PAD)
    assert w3row.shape == (1, H2_PAD) and b3.shape == (1, 1)

    # Single lane-packed bf16 input stream (halves input DMA vs two f32 streams).
    xu = jnp.concatenate([x, u], axis=1).astype(jnp.bfloat16)

    # Batch tiling: 16-aligned rows (bf16 packing); at least 2 grid steps when the batch
    # allows (feeds both v7x TensorCores); big blocks amortize per-step overhead elsewhere.
    bm = _round_up(min(block_m, _round_up(pl.cdiv(B, 2), 16)), 16)
    b_pad = _round_up(B, bm)
    if b_pad != B:
        xu = jnp.pad(xu, ((0, b_pad - B), (0, 0)))
    grid_m = b_pad // bm

    def const_spec(shape):
        return pl.BlockSpec(shape, lambda i: (0,) * len(shape))

    flops = 2 * b_pad * (in_dim * H1_PAD + H1_PAD * H2_PAD
                         + in_dim * H2_PAD + H2_PAD)
    bytes_accessed = (2 * (b_pad * in_dim + w1e.size + w2x.size + w2ue.size)
                      + 4 * (b1.size + b2.size + w3row.size + b3.size + b_pad))

    out = pl.pallas_call(
        _critic_kernel,
        out_shape=jax.ShapeDtypeStruct((grid_m, 1, bm), jnp.float32),
        grid=(grid_m,),
        in_specs=[
            pl.BlockSpec((bm, in_dim), lambda i: (i, 0)),            # xu   bf16 [bm, in]
            const_spec(w1e.shape),                                   # W1e  bf16 [in, 256]
            const_spec(b1.shape),                                    # b1   f32  [1, 256]
            const_spec(w2x.shape),                                   # W2x  bf16 [256, 128]
            const_spec(w2ue.shape),                                  # W2ue bf16 [in, 128]
            const_spec(b2.shape),                                    # b2   f32  [1, 128]
            const_spec(w3row.shape),                                 # w3   f32  [1, 128]
            pl.BlockSpec(memory_space=pltpu.MemorySpace.SMEM),       # b3   f32  [1, 1]
        ],
        out_specs=pl.BlockSpec((1, 1, bm), lambda i: (i, 0, 0)),     # lane-dense output
        compiler_params=pltpu.CompilerParams(
            dimension_semantics=("parallel",)),
        cost_estimate=pl.CostEstimate(flops=int(flops), transcendentals=0,
                                      bytes_accessed=int(bytes_accessed)),
    )(xu, w1e, b1, w2x, w2ue, b2, w3row, b3)

    return out.reshape(b_pad, 1)[:B]


def init_params(key, state_dim, action_dim):
    """nn.Linear-style init: U(-1/sqrt(fan_in), +1/sqrt(fan_in)); unpadded, [in, out] layout."""
    ks = jax.random.split(key, 6)

    def lin(kw, kb, fan_in, fan_out):
        bound = 1.0 / math.sqrt(fan_in)
        w = jax.random.uniform(kw, (fan_in, fan_out), jnp.float32, -bound, bound)
        b = jax.random.uniform(kb, (1, fan_out), jnp.float32, -bound, bound)
        return w, b

    w1, b1 = lin(ks[0], ks[1], state_dim, H1)
    w2, b2 = lin(ks[2], ks[3], H1 + action_dim, H2)
    w3, b3 = lin(ks[4], ks[5], H2, 1)
    return (w1, b1, w2, b2, w3, b3)


def pad_params(params):
    """Zero-pad hidden dims to lane multiples, extend W1/W2u to consume the merged xu,
    and store the matmul weights in bf16 (biases / w3 row stay f32)."""
    w1, b1, w2, b2, w3, b3 = params
    state_dim = w1.shape[0]
    action_dim = w2.shape[0] - H1
    in_dim = state_dim + action_dim

    # Layer 1: zero rows for the action columns of xu.
    w1_ext = jnp.zeros((in_dim, H1_PAD), jnp.float32).at[:state_dim, :H1].set(w1)
    b1_p = jnp.pad(b1, ((0, 0), (0, H1_PAD - H1)))

    # Layer 2: h1-path weights (padded) and u-path weights extended over xu.
    w2x_p = jnp.zeros((H1_PAD, H2_PAD), jnp.float32).at[:H1, :H2].set(w2[:H1, :])
    w2u_ext = jnp.zeros((in_dim, H2_PAD), jnp.float32).at[state_dim:, :H2].set(w2[H1:, :])
    b2_p = jnp.pad(b2, ((0, 0), (0, H2_PAD - H2)))

    # Layer 3: w3 as a lane row, padded; b3 as an SMEM scalar.
    w3row_p = jnp.pad(w3.T, ((0, 0), (0, H2_PAD - H2)))   # [1, 128] f32
    b3_s = b3.reshape(1, 1)

    return (w1_ext.astype(jnp.bfloat16), b1_p,
            w2x_p.astype(jnp.bfloat16), w2u_ext.astype(jnp.bfloat16), b2_p,
            w3row_p, b3_s)


def reference_forward(x, u, params):
    """Pure-JAX f32 reference (same math as the PyTorch module), unpadded."""
    w1, b1, w2, b2, w3, b3 = params
    h1 = jax.nn.relu(x @ w1 + b1)
    cat = jnp.concatenate([h1, u], axis=1)
    h2 = jax.nn.relu(cat @ w2 + b2)
    return h2 @ w3 + b3


if __name__ == "__main__":
    state_dim, action_dim, batch = 16, 8, 2

    key = jax.random.PRNGKey(0)
    kp, kx, ku = jax.random.split(key, 3)
    params = init_params(kp, state_dim, action_dim)
    pparams = pad_params(params)

    x = jax.random.normal(kx, (batch, state_dim), jnp.float32)
    u = jax.random.normal(ku, (batch, action_dim), jnp.float32)

    out = jax.block_until_ready(ddpg_critic(x, u, pparams))
    ref = reference_forward(x, u, params)
    assert out.shape == (batch, 1), out.shape
    # bf16 matmul operands (f32 accumulation) -> tolerance looser than pure f32.
    assert jnp.allclose(out, ref, atol=5e-2, rtol=5e-2), float(jnp.abs(out - ref).max())

    # Exercise the multi-block grid path (batch padding + weight residency across steps).
    kx2, ku2 = jax.random.split(kx)
    B2 = 40
    x2 = jax.random.normal(kx2, (B2, state_dim), jnp.float32)
    u2 = jax.random.normal(ku2, (B2, action_dim), jnp.float32)

    out2 = jax.block_until_ready(ddpg_critic(x2, u2, pparams, block_m=16))   # 3-step grid
    ref2 = reference_forward(x2, u2, params)
    assert out2.shape == (B2, 1), out2.shape
    assert jnp.allclose(out2, ref2, atol=5e-2, rtol=5e-2), float(jnp.abs(out2 - ref2).max())

    out3 = jax.block_until_ready(ddpg_critic(x2, u2, pparams))               # default (2-step) grid
    assert jnp.allclose(out3, ref2, atol=5e-2, rtol=5e-2), float(jnp.abs(out3 - ref2).max())

    print("KERNEL_OK")
</pallas_src>

<mosaic_0001>
module attributes {stable_mosaic.version = 11 : i64} {
  func.func @_critic_kernel(%arg0: i32, %arg1: memref<16x24xbf16, #tpu.memory_space<vmem>>, %arg2: memref<24x256xbf16, #tpu.memory_space<vmem>>, %arg3: memref<1x256xf32, #tpu.memory_space<vmem>>, %arg4: memref<256x128xbf16, #tpu.memory_space<vmem>>, %arg5: memref<24x128xbf16, #tpu.memory_space<vmem>>, %arg6: memref<1x128xf32, #tpu.memory_space<vmem>>, %arg7: memref<1x128xf32, #tpu.memory_space<vmem>>, %arg8: memref<1x1xf32, #tpu.memory_space<smem>>, %arg9: memref<1x1x16xf32, #tpu.memory_space<vmem>>) attributes {dimension_semantics = [#tpu.dimension_semantics<parallel>], iteration_bounds = array<i64: 1>, scalar_prefetch = 0 : i64, scratch_operands = 0 : i64, tpu.core_type = #tpu.core_type<tc>, window_params = [{transform_indices = @transform_0, window_bounds = array<i64: 16, 24>}, {pipeline_mode = #tpu.pipeline_mode<synchronous>, transform_indices = @transform_1, window_bounds = array<i64: 24, 256>}, {pipeline_mode = #tpu.pipeline_mode<synchronous>, transform_indices = @transform_2, window_bounds = array<i64: 1, 256>}, {pipeline_mode = #tpu.pipeline_mode<synchronous>, transform_indices = @transform_3, window_bounds = array<i64: 256, 128>}, {pipeline_mode = #tpu.pipeline_mode<synchronous>, transform_indices = @transform_4, window_bounds = array<i64: 24, 128>}, {pipeline_mode = #tpu.pipeline_mode<synchronous>, transform_indices = @transform_5, window_bounds = array<i64: 1, 128>}, {pipeline_mode = #tpu.pipeline_mode<synchronous>, transform_indices = @transform_6, window_bounds = array<i64: 1, 128>}, {transform_indices = @transform_7, window_bounds = array<i64: 1, 1>}, {transform_indices = @transform_8, window_bounds = array<i64: 1, 1, 16>}]} {
    %c0 = arith.constant 0 : index
    %c0_0 = arith.constant 0 : index
    %0 = vector.load %arg1[%c0, %c0_0] : memref<16x24xbf16, #tpu.memory_space<vmem>>, vector<16x24xbf16>
    %c0_1 = arith.constant 0 : index
    %c0_2 = arith.constant 0 : index
    %1 = vector.load %arg2[%c0_1, %c0_2] : memref<24x256xbf16, #tpu.memory_space<vmem>>, vector<24x256xbf16>
    %cst = arith.constant dense<0.000000e+00> : vector<16x256xf32>
    %2 = tpu.matmul %0, %1, %cst {dimension_numbers = #tpu.dot_dimension_numbers<[1], [0], [0], [1], [0, 0, 1, 1], [], []>} : vector<16x24xbf16>, vector<24x256xbf16>, vector<16x256xf32> -> vector<16x256xf32>
    %c0_3 = arith.constant 0 : index
    %c0_4 = arith.constant 0 : index
    %3 = vector.load %arg3[%c0_3, %c0_4] : memref<1x256xf32, #tpu.memory_space<vmem>>, vector<1x256xf32>
    %4 = vector.broadcast %3 : vector<1x256xf32> to vector<16x256xf32>
    %5 = arith.addf %2, %4 : vector<16x256xf32>
    %cst_5 = arith.constant 0.000000e+00 : f32
    %6 = vector.broadcast %cst_5 : f32 to vector<16x256xf32>
    %7 = arith.maximumf %5, %6 : vector<16x256xf32>
    %8 = arith.truncf %7 : vector<16x256xf32> to vector<16x256xbf16>
    %c0_6 = arith.constant 0 : index
    %c0_7 = arith.constant 0 : index
    %9 = vector.load %arg4[%c0_6, %c0_7] : memref<256x128xbf16, #tpu.memory_space<vmem>>, vector<256x128xbf16>
    %cst_8 = arith.constant dense<0.000000e+00> : vector<16x128xf32>
    %10 = tpu.matmul %8, %9, %cst_8 {dimension_numbers = #tpu.dot_dimension_numbers<[1], [0], [0], [1], [0, 0, 1, 1], [], []>} : vector<16x256xbf16>, vector<256x128xbf16>, vector<16x128xf32> -> vector<16x128xf32>
    %c0_9 = arith.constant 0 : index
    %c0_10 = arith.constant 0 : index
    %11 = vector.load %arg5[%c0_9, %c0_10] : memref<24x128xbf16, #tpu.memory_space<vmem>>, vector<24x128xbf16>
    %cst_11 = arith.constant dense<0.000000e+00> : vector<16x128xf32>
    %12 = tpu.matmul %0, %11, %cst_11 {dimension_numbers = #tpu.dot_dimension_numbers<[1], [0], [0], [1], [0, 0, 1, 1], [], []>} : vector<16x24xbf16>, vector<24x128xbf16>, vector<16x128xf32> -> vector<16x128xf32>
    %13 = arith.addf %10, %12 : vector<16x128xf32>
    %c0_12 = arith.constant 0 : index
    %c0_13 = arith.constant 0 : index
    %14 = vector.load %arg6[%c0_12, %c0_13] : memref<1x128xf32, #tpu.memory_space<vmem>>, vector<1x128xf32>
    %15 = vector.broadcast %14 : vector<1x128xf32> to vector<16x128xf32>
    %16 = arith.addf %13, %15 : vector<16x128xf32>
    %cst_14 = arith.constant 0.000000e+00 : f32
    %17 = vector.broadcast %cst_14 : f32 to vector<16x128xf32>
    %18 = arith.maximumf %16, %17 : vector<16x128xf32>
    %c0_15 = arith.constant 0 : index
    %c0_16 = arith.constant 0 : index
    %19 = vector.load %arg7[%c0_15, %c0_16] : memref<1x128xf32, #tpu.memory_space<vmem>>, vector<1x128xf32>
    %cst_17 = arith.constant dense<0.000000e+00> : vector<1x16xf32>
    %20 = tpu.matmul %19, %18, %cst_17 {dimension_numbers = #tpu.dot_dimension_numbers<[1], [1], [0], [0], [0, 0, 1, 0], [], []>} : vector<1x128xf32>, vector<16x128xf32>, vector<1x16xf32> -> vector<1x16xf32>
    %c0_18 = arith.constant 0 : index
    %c0_19 = arith.constant 0 : index
    %21 = memref.load %arg8[%c0_18, %c0_19] : memref<1x1xf32, #tpu.memory_space<smem>>
    %22 = vector.broadcast %21 : f32 to vector<1x16xf32>
    %23 = arith.addf %20, %22 : vector<1x16xf32>
    %24 = vector.shape_cast %23 : vector<1x16xf32> to vector<1x1x16xf32>
    %c0_20 = arith.constant 0 : index
    %c0_21 = arith.constant 0 : index
    %c0_22 = arith.constant 0 : index
    %25 = vector.load %arg9[%c0_20, %c0_21, %c0_22] : memref<1x1x16xf32, #tpu.memory_space<vmem>>, vector<1x1x16xf32>
    tpu.vector_store %arg9[%c0_20, %c0_21, %c0_22], %24 {strides = array<i32>} : memref<1x1x16xf32, #tpu.memory_space<vmem>>, vector<1x1x16xf32>,
    return
  }
  func.func @transform_0(%arg0: i32) -> (i32, i32) {
    %c0_i32 = arith.constant 0 : i32
    %c0_i32_0 = arith.constant 0 : i32
    return %arg0, %c0_i32 : i32, i32
  }
  func.func @transform_1(%arg0: i32) -> (i32, i32) {
    %c0_i32 = arith.constant 0 : i32
    %c0_i32_0 = arith.constant 0 : i32
    %c0_i32_1 = arith.constant 0 : i32
    return %c0_i32, %c0_i32_0 : i32, i32
  }
  func.func @transform_2(%arg0: i32) -> (i32, i32) {
    %c0_i32 = arith.constant 0 : i32
    %c0_i32_0 = arith.constant 0 : i32
    %c0_i32_1 = arith.constant 0 : i32
    return %c0_i32, %c0_i32_0 : i32, i32
  }
  func.func @transform_3(%arg0: i32) -> (i32, i32) {
    %c0_i32 = arith.constant 0 : i32
    %c0_i32_0 = arith.constant 0 : i32
    %c0_i32_1 = arith.constant 0 : i32
    return %c0_i32, %c0_i32_0 : i32, i32
  }
  func.func @transform_4(%arg0: i32) -> (i32, i32) {
    %c0_i32 = arith.constant 0 : i32
    %c0_i32_0 = arith.constant 0 : i32
    %c0_i32_1 = arith.constant 0 : i32
    return %c0_i32, %c0_i32_0 : i32, i32
  }
  func.func @transform_5(%arg0: i32) -> (i32, i32) {
    %c0_i32 = arith.constant 0 : i32
    %c0_i32_0 = arith.constant 0 : i32
    %c0_i32_1 = arith.constant 0 : i32
    return %c0_i32, %c0_i32_0 : i32, i32
  }
  func.func @transform_6(%arg0: i32) -> (i32, i32) {
    %c0_i32 = arith.constant 0 : i32
    %c0_i32_0 = arith.constant 0 : i32
    %c0_i32_1 = arith.constant 0 : i32
    return %c0_i32, %c0_i32_0 : i32, i32
  }
  func.func @transform_7(%arg0: i32) -> (i32, i32) {
    %c0_i32 = arith.constant 0 : i32
    %c0_i32_0 = arith.constant 0 : i32
    %c0_i32_1 = arith.constant 0 : i32
    return %c0_i32, %c0_i32_0 : i32, i32
  }
  func.func @transform_8(%arg0: i32) -> (i32, i32, i32) {
    %c0_i32 = arith.constant 0 : i32
    %c0_i32_0 = arith.constant 0 : i32
    %c0_i32_1 = arith.constant 0 : i32
    return %arg0, %c0_i32, %c0_i32_0 : i32, i32, i32
  }
}

</mosaic_0001>

<bundles_post_ra>
// kernel: tpu_custom_call.1
= control target key start
LH: loop header
LB: loop body
LE: loop exit
PB: predicated region body
PF: predicated region fallthrough
CT: control target
= control target key end

     0   :  { %14 = vsyncpa [#allocation4], 0  ;;  %s828_s0 = inlined_call_operand.hbm [shape: bf16[16,24], index: 0, kind: input, shape index: {}]   ;;  %s829_s1 = inlined_call_operand.hbm [shape: bf16[24,256], index: 1, kind: input, shape index: {}]   ;;  %s830_s2 = inlined_call_operand.vmem [shape: f32[1,256], index: 2, kind: input, shape index: {}]   ;;  %s831_s3 = inlined_call_operand.hbm [shape: bf16[256,128], index: 3, kind: input, shape index: {}]   ;;  %s832_s4 = inlined_call_operand.vmem [shape: bf16[24,128], index: 4, kind: input, shape index: {}]   ;;  %s833_s5 = inlined_call_operand.vmem [shape: f32[1,128], index: 5, kind: input, shape index: {}]   ;;  %s834_s6 = inlined_call_operand.vmem [shape: f32[1,128], index: 6, kind: input, shape index: {}]   ;;  %s835_s7 = inlined_call_operand.<no memory space> [shape: f32[1,1], index: 7, kind: input, shape index: {}]   ;;  %s836_s8 = inlined_call_operand.hbm [shape: f32[1,1,16], index: 8, kind: output, shape index: {}]  }
   0x1   :  { %15 = vsyncpa [#allocation7], 0 }
   0x2   :  { %16 = vsyncpa [#allocation5], 0  ;;  %s700_s27 = smov [#allocation6]   ;;  %s606_s9 = scalar_lea.hbm %s829_s1, 384 }
   0x3   :  { %s34_s28 = sshll.u32 %s700_s27, 4  ;;  %p607_p0 = scmp.ne.s32.totalorder %s829_s1, %s606_s9  ;;  %s35_s28 = int_to_ptr.vmem [resolvable:$true] %s34_s28 }
   0x4   :  { %p610_p1 = scmp.lt.u32.totalorder %s606_s9, %s829_s1 }
   0x6   :  { %p612_p2 = pnand %p610_p1, %p607_p0 }
   0x8   :  { %615 = shalt.err (!%p612_p2)
}
   0x9   :  { %s616_s14 = scalar_lea.vmem %s35_s28, 384  ;;  %p621_p4 = scmp.lt.s32.totalorder %s35_s28, %s35_s28 }
   0xa   :  { %p617_p3 = scmp.ne.s32.totalorder %s35_s28, %s616_s14  ;;  %p622_p5 = scmp.lt.s32.totalorder %s616_s14, %s616_s14 }
   0xc   :  { %p623_p6 = por %p622_p5, %p621_p4 }
   0xe   :  { %p624_p7 = pnand %p623_p6, %p617_p3 }
  0x10   :  { %627 = shalt.err (!%p624_p7)
}
  0x11   :  { %s701_s15 = smov 128   ;;  %s702_s16 = smov 8  }
  0x12   :  { %40 = dma.hbm_to_vmem [thread:$0]  %s829_s1, 384, %s35_s28, [#allocation7], %s701_s15, %s701_s15, %s702_s16  }
  0x13   :  { %s703_s19 = smov [#allocation3]   ;;  %s628_s23 = scalar_lea.hbm %s828_s0, 128 }
  0x14   :  { %s22_s20 = sshll.u32 %s703_s19, 4  ;;  %p629_p8 = scmp.ne.s32.totalorder %s828_s0, %s628_s23  ;;  %s23_s20 = int_to_ptr.vmem [resolvable:$true] %s22_s20 }
  0x15   :  { %p632_p9 = scmp.lt.u32.totalorder %s628_s23, %s828_s0 }
  0x17   :  { %p634_p10 = pnand %p632_p9, %p629_p8 }
  0x19   :  { %637 = shalt.err (!%p634_p10)
}
  0x1a   :  { %s638_s29 = scalar_lea.vmem %s23_s20, 128  ;;  %p643_p12 = scmp.lt.s32.totalorder %s23_s20, %s23_s20 }
  0x1b   :  { %p639_p11 = scmp.ne.s32.totalorder %s23_s20, %s638_s29  ;;  %p644_p13 = scmp.lt.s32.totalorder %s638_s29, %s638_s29 }
  0x1d   :  { %p645_p0 = por %p644_p13, %p643_p12 }
  0x1f   :  { %p646_p1 = pnand %p645_p0, %p639_p11 }
  0x21   :  { %649 = shalt.err (!%p646_p1)
}
  0x22   :  { %s704_s1 = smov 64   ;;  %s705_s28 = smov 4  }
  0x23   :  { %28 = dma.hbm_to_vmem [thread:$0]  %s828_s0, 128, %s23_s20, [#allocation4], %s704_s1, %s704_s1, %s705_s28  }
  0x24   :  { %s706_s10 = smov [#allocation8]   ;;  %s650_s14 = scalar_lea.hbm %s831_s3, 2048 }
  0x25   :  { %s48_s11 = sshll.u32 %s706_s10, 4  ;;  %p651_p2 = scmp.ne.s32.totalorder %s831_s3, %s650_s14  ;;  %s49_s11 = int_to_ptr.vmem [resolvable:$true] %s48_s11 }
  0x26   :  { %p654_p3 = scmp.lt.u32.totalorder %s650_s14, %s831_s3 }
  0x28   :  { %p656_p4 = pnand %p654_p3, %p651_p2 }
  0x2a   :  { %659 = shalt.err (!%p656_p4)
}
  0x2b   :  { %s660_s19 = scalar_lea.vmem %s49_s11, 2048  ;;  %p665_p6 = scmp.lt.s32.totalorder %s49_s11, %s49_s11 }
  0x2c   :  { %p661_p5 = scmp.ne.s32.totalorder %s49_s11, %s660_s19  ;;  %p666_p7 = scmp.lt.s32.totalorder %s660_s19, %s660_s19 }
  0x2e   :  { %p667_p8 = por %p666_p7, %p665_p6 }
  0x30   :  { %p668_p9 = pnand %p667_p8, %p661_p5 }
  0x32   :  { %671 = shalt.err (!%p668_p9)
}
  0x33   :  { %54 = dma.hbm_to_vmem [thread:$0]  %s831_s3, 2048, %s49_s11, [#allocation7], %s704_s1, %s704_s1, %s705_s28  }
  0x34   :  { %694 = dma.done.wait [#allocation4], 128  }
  0x35   :  { %695 = vsyncadd [#allocation4], 4294967168 }
  0x36   :  { %696 = dma.done.wait [#allocation7], 2432  }
  0x37   :  { %697 = vsyncadd [#allocation7], 4294964864  ;;  %v707_v0 = vmov 0   ;;  %v582_v1 = vld [vmem:[#allocation6 + $0x4] ss:$8 sps:$4 sm:$0xff]   ;;  %v77_v3 = vld [vmem:[#allocation6 + $0x10] sm:$0xff]  ;;  %v80_v28 = vlaneseq }
  0x38   :  { %153 = vmatprep.mubr.bf16.mxu1 %v707_v0  ;;  %v584_v2 = vld [vmem:[#allocation6] ss:$8 sps:$4 sm:$0xff]   ;;  %vm114_vm0 = vcmask 1043456   ;;  %121 = vmatprep.subr.bf16.mxu1 %v582_v1  ;;  %v501_v4 = vcombine.high %v77_v3, %v77_v3  ;;  %v500_v5 = vcombine.low %v77_v3, %v77_v3  ;;  %v588_v6 = vld [vmem:[#allocation8 + $0x40] sm:$0xff]   ;;  %vm110_vm1 = vcmask 195584   ;;  %v594_v14 = vld [vmem:[#allocation8 + $0x58] sm:$0xff]  }
  0x39   :  { %122 = vmatpush1.bf16.msra.mxu1 %v584_v2  ;;  %v587_v8 = vld [vmem:[#allocation3] sm:$0xff]   ;;  %527 = vmatprep.subr.bf16.mxu0 %v588_v6  ;;  %v590_v10 = vld [vmem:[#allocation8 + $0x48] sm:$0xff]   ;;  %v592_v12 = vld [vmem:[#allocation8 + $0x50] sm:$0xff]   ;;  %v708_v23 = vmov 0.0   ;;  %vm709_vm2 = vmmov 0   ;;  %v81_v29 = vshrl.u32 %v80_v28, 7 }
  0x3a   :  { %502 = vmatprep.subr.msk.bf16.mxu1 %vm114_vm0, %v501_v4  ;;  %v116_v7 = vsel %vm114_vm0, %v500_v5, 0  ;;  %v589_v9 = vld [vmem:[#allocation8] sm:$0xff]   ;;  %v591_v11 = vld [vmem:[#allocation8 + $0x8] sm:$0xff]   ;;  %v593_v13 = vld [vmem:[#allocation8 + $0x10] sm:$0xff]   ;;  %v710_v53 = vmov 0.0|0.0   ;;  %v408_v5 = vstv %s835_s7  ;;  %vm479_vm3 = vcmask 122880  }
  0x3b   :  { %528 = vmatpush3.bf16.msra.mxu0 %v589_v9  ;;  %v595_v15 = vld [vmem:[#allocation8 + $0x18] sm:$0xff]   ;;  %v596_v16 = vld [vmem:[#allocation8 + $0x60] sm:$0xff]   ;;  %v598_v18 = vld [vmem:[#allocation8 + $0x68] sm:$0xff]   ;;  %v82_v30 = vsub.s32 0, %v81_v29  ;;  %v86_v32 = vsub.s32 1, %v81_v29 }
  0x3c   :  { %529 = vmatprep.subr.bf16.mxu0 %v590_v10  ;;  %v597_v17 = vld [vmem:[#allocation8 + $0x20] sm:$0xff]   ;;  %v599_v19 = vld [vmem:[#allocation8 + $0x28] sm:$0xff]   ;;  %v600_v20 = vld [vmem:[#allocation8 + $0x70] sm:$0xff]  }
  0x3d   :  { %124 = vmatpush1.bf16.msra.mxu1 %v116_v7  ;;  %v601_v21 = vld [vmem:[%s832_s4] sm:$0xff]   ;;  %v602_v22 = vld [vmem:[#allocation8 + $0x30] sm:$0xff]   ;;  %v603_v24 = vld [vmem:[#allocation8 + $0x78] sm:$0xff]  }
  0x3e   :  { %552 = vmatprep.subr.bf16.mxu1 %v708_v23  ;;  %v604_v25 = vld [vmem:[%s832_s4 + $0x8] ss:$0 sps:$4 sm:$0xff]   ;;  %v605_v26 = vld [vmem:[#allocation8 + $0x38] sm:$0xff]   ;;  %v78_v31 = vld [vmem:[%s830_s2] sm:$0x3] }
  0x3f   :  { %530 = vmatpush3.bf16.msra.mxu0 %v591_v11  ;;  %v215_v27 = vsel %vm114_vm0, %v604_v25, 0  ;;  %v83_v33 = vrot.slane %v78_v31, %v82_v30  ;;  %v87_v34 = vrot.slane %v78_v31, %v86_v32  ;;  %v523_v58 = vld [vmem:[%s833_s5] ss:$0 sm:$0xff]  ;;  %s711_s5 = smov [#allocation9]  }
  0x40   :  { %503 = vmatmul.mubr.msk.bf16.vlgmr.msra.gmra.mrb[0].mxu1 %vm110_vm1, %v587_v8  ;;  %531 = vmatprep.subr.bf16.mxu0 %v592_v12  ;;  %v406_v4 = vld [vmem:[%s834_s6] sm:$0x1]  ;;  %s487_s28 = sshll.u32 %s711_s5, 4  ;;  %s488_s28 = int_to_ptr.vmem [resolvable:$true] %s487_s28 }
  0x41   :  { %553 = vmatpush3.bf16.msra.mxu1 %v601_v21  ;;  %556 = vmatprep.mubr.msk.bf16.mxu1 %vm709_vm2, %v708_v23  ;;  %s672_s30 = scalar_lea.vmem %s488_s28, 16  ;;  %s676_s9 = scalar_lea.vmem %s488_s28, 32 }
  0x42   :  { %554 = vmatprep.subr.bf16.mxu1 %v708_v23  ;;  %p673_p10 = scmp.ne.s32.totalorder %s488_s28, %s672_s30  ;;  %p677_p11 = scmp.lt.s32.totalorder %s488_s28, %s488_s28 }
  0x43   :  { %532 = vmatpush3.bf16.msra.mxu0 %v593_v13  ;;  %p678_p12 = scmp.lt.s32.totalorder %s676_s9, %s672_s30 }
  0x44   :  { %533 = vmatprep.subr.bf16.mxu0 %v594_v14 }
  0x45   :  { %555 = vmatpush3.bf16.msra.mxu1 %v215_v27  ;;  %p679_p13 = por %p678_p12, %p677_p11 }
  0x46   :  { %567 = vmatprep.subr.bf16.mxu1 %v710_v53 }
  0x47   :  { %534 = vmatpush3.bf16.msra.mxu0 %v595_v15  ;;  %p680_p0 = pnand %p679_p13, %p673_p10 }
  0x48   :  { %535 = vmatprep.subr.bf16.mxu0 %v596_v16  ;;  %557 = vmatmul.mubr.msk.bf16.vlgmr.msra.gmra.mrb[4].mxu1 %vm110_vm1, %v587_v8 }
  0x49   :  { %564 = vmatprep.mubr.msk.f32.mxu1 %vm709_vm2, %v708_v23 }
  0x4b   :  { %536 = vmatpush3.bf16.msra.mxu0 %v597_v17 }
  0x4c   :  { %537 = vmatprep.subr.bf16.mxu0 %v598_v18 }
  0x4f   :  { %538 = vmatpush3.bf16.msra.mxu0 %v599_v19 }
  0x50   :  { %539 = vmatprep.subr.bf16.mxu0 %v600_v20 }
  0x53   :  { %540 = vmatpush3.bf16.msra.mxu0 %v602_v22 }
  0x54   :  { %541 = vmatprep.subr.bf16.mxu0 %v603_v24 }
  0x57   :  { %542 = vmatpush3.bf16.msra.mxu0 %v605_v26 }
 0x113   :  { %v155_v35 = vpop.f32.mrb[0].mxu1 }
 0x114   :  { %v156_v36 = vadd.f32 %v155_v35, %v83_v33  ;;  %v157_v37 = vpop.f32.mrb[1].mxu1 }
 0x115   :  { %v158_v38 = vadd.f32 %v157_v37, %v87_v34  ;;  %v159_v39 = vpop.f32.mrb[2].mxu1 }
 0x116   :  { %v160_v40 = vadd.f32 %v159_v39, %v83_v33  ;;  %v161_v41 = vpop.f32.mrb[3].mxu1  ;;  %v164_v43 = vmax.f32 %v156_v36, 0.0 }
 0x117   :  { %v162_v42 = vadd.f32 %v161_v41, %v87_v34  ;;  %v165_v45 = vmax.f32 %v158_v38, 0.0 }
 0x118   :  { %v166_v44 = vmax.f32 %v160_v40, 0.0 }
 0x119   :  { %v167_v46 = vmax.f32 %v162_v42, 0.0 }
 0x11a   :  { %v168_v47 = vpack.c.bf16 %v166_v44, %v164_v43 }
 0x11b   :  { %v169_v48 = vpack.c.bf16 %v167_v46, %v165_v45  ;;  %v251_v49 = vpop.f32.mrb[4].mxu1 }
 0x11c   :  { %v558_v50 = vpop.f32.mrb[5].mxu1 }
 0x11d   :  { %386 = vmatprep.mubr.bf16.mxu0 %v169_v48  ;;  %v254_v51 = vpop.f32.mrb[6].mxu1 }
 0x11e   :  { %387 = vmatmul.mubr.bf16.vlgmr.msra.gmra.mrb[0].mxu0 %v168_v47  ;;  %v559_v52 = vpop.f32.mrb[7].mxu1 }
 0x1f1   :  { %v543_v54 = vpop.f32.mrb[0].mxu0 }
 0x1f2   :  { %v544_v55 = vpop.f32.mrb[1].mxu0 }
 0x1f3   :  { %v545_v56 = vadd.f32 %v544_v55, %v543_v54  ;;  %v546_v57 = vpop.f32.mrb[2].mxu0 }
 0x1f4   :  { %v547_v59 = vpop.f32.mrb[3].mxu0 }
 0x1f5   :  { %v389_v60 = vadd.f32 %v545_v56, %v251_v49  ;;  %v548_v61 = vadd.f32 %v547_v59, %v546_v57 }
 0x1f7   :  { %v402_v62 = vadd.f32 %v523_v58, %v389_v60  ;;  %v392_v63 = vadd.f32 %v548_v61, %v254_v51 }
 0x1f9   :  { %v403_v0 = vadd.f32 %v523_v58, %v392_v63  ;;  %v404_v1 = vmax.f32 %v402_v62, 0.0 }
 0x1fb   :  { %v405_v2 = vmax.f32 %v403_v0, 0.0 }
 0x1fd   :  { %v568_v3 = vpack.c.bf16 %v405_v2, %v404_v1 }
 0x1ff   :  { %569 = vmatpush3.bf16.xpose.msra.mxu1 %v568_v3 }
 0x206   :  { %565 = vmatmul.mubr.f32.vlgmr.msra.gmra.mrb[8].mxu1 %v406_v4 }
 0x2d9   :  { %v475_v6 = vpop.f32.mrb[8].mxu1 }
 0x2da   :  { %v476_v7 = vadd.f32 %v475_v6, %v408_v5  ;;  %v566_v8 = vpop.f32.mrb[9].mxu1 }
 0x2dc   :  { %480 = vst.msk [vmem:[#allocation9] sm:$0x1] %vm479_vm3, %v476_v7 }
 0x2dd   :  { %683 = shalt.err (!%p680_p0)
}
 0x2de   :  { %s684_s7 = scalar_lea.hbm %s836_s8, 16 }
 0x2df   :  { %p685_p1 = scmp.ne.s32.totalorder %s836_s8, %s684_s7  ;;  %p688_p2 = scmp.lt.u32.totalorder %s684_s7, %s836_s8 }
 0x2e1   :  { %p690_p3 = pnand %p688_p2, %p685_p1 }
 0x2e3   :  { %693 = shalt.err (!%p690_p3)
}
 0x2e4   :  { %490 = dma.vmem_to_hbm [thread:$0]  %s488_s28, 16, %s836_s8, [#allocation5]  }
 0x2e5   :  { %698 = dma.done.wait [#allocation5], 16  }
 0x2e6   :  { %699 = vsyncadd [#allocation5], 4294967280 }
 0x2e7   :  { %494 = vsyncpa [#allocation4], 1 }
 0x2e8   :  { %495 = vsyncpa [#allocation7], 1 }
 0x2e9   :  { %496 = vsyncpa [#allocation5], 1 }

</bundles_post_ra>
